<compile_context>
chip_gen: v7x
topology: tpu7x:2x2x1
jax: 0.10.0
libtpu: 0.0.40
codegen_flags: <defaults>
</compile_context>

<pallas_src>
import jax
import jax.numpy as jnp
from jax.experimental import pallas as pl
from jax.experimental.pallas import tpu as pltpu


def _lm_head_kernel(h_ref, w_ref, o_ref):
    # h_ref: [tn, H]   w_ref: [H, tv]   o_ref: [tn, tv]
    o_ref[...] = jnp.dot(
        h_ref[...], w_ref[...], preferred_element_type=jnp.float32
    ).astype(o_ref.dtype)


def _pick_tile(dim, requested, align):
    """Largest multiple of `align` that divides `dim` and is <= `requested`;
    falls back to the full dim (full-extent blocks are always legal)."""
    t = min(requested, dim)
    t -= t % align
    while t >= align:
        if dim % t == 0:
            return t
        t -= align
    return dim


def lm_pipe_layer(
    hidden_states,
    labels,
    weight,
    *,
    tv=512,
    tn=256,
    compute_dtype=jnp.bfloat16,
    out_dtype=None,
):
    """hidden_states: [S, B, H]; weight: [H, V] (pre-transposed Linear weight).

    Returns (logits [B, S, V] in `out_dtype` (default: hidden_states.dtype), labels).
    """
    S, B, H = hidden_states.shape
    Hw, V = weight.shape
    assert H == Hw, (H, Hw)
    out_dtype = hidden_states.dtype if out_dtype is None else out_dtype

    N = B * S  # flattened token axis (B-major, matches [B, S, V] output layout)

    in_bytes = jnp.dtype(compute_dtype).itemsize
    out_bytes = jnp.dtype(out_dtype).itemsize

    tv = _pick_tile(V, tv, 128)  # lane-dense vocab tile
    tn = _pick_tile(N, tn, 8)    # sublane-aligned token tile

    def _footprint(tn_, tv_):
        # Double-buffered inputs + double-buffered output tile.
        return 2 * (tn_ * H + H * tv_) * in_bytes + 2 * tn_ * tv_ * out_bytes

    # Auto-shrink tiles so the working set stays within a conservative VMEM budget
    # (v7x has only 64 MiB / TC; leave headroom for compiler scratch).
    budget = 48 * 1024 * 1024
    while _footprint(tn, tv) > budget and tv > 128:
        tv = _pick_tile(V, max(tv // 2, 128), 128)
    while _footprint(tn, tv) > budget and tn > 8:
        tn = _pick_tile(N, max(tn // 2, 8), 8)

    # Small one-time relayout + cast of the hidden slab (fused by XLA); the big
    # transpose on the logits is absorbed by the token-major output layout below.
    h_nh = jnp.transpose(hidden_states, (1, 0, 2)).reshape(N, H).astype(compute_dtype)
    w = weight.astype(compute_dtype)

    need = _footprint(tn, tv)
    vmem_limit = int(min(max(2 * need, 32 * 1024 * 1024), 64 * 1024 * 1024))

    grid = (V // tv, N // tn)  # vocab outermost: each weight tile DMA'd exactly once

    logits = pl.pallas_call(
        _lm_head_kernel,
        out_shape=jax.ShapeDtypeStruct((N, V), out_dtype),
        grid=grid,
        in_specs=[
            # hidden [N, H]: token-tiled, full H (contraction dim stays whole).
            pl.BlockSpec((tn, H), lambda j, i: (i, 0)),
            # weight [H, V]: vocab-tiled column block; index depends only on the
            # outermost axis -> re-DMA'd only when the vocab tile changes.
            pl.BlockSpec((H, tv), lambda j, i: (0, j)),
        ],
        # logits written token-major; reshape to [B, S, V] below is a free view,
        # which is exactly the PyTorch transpose(0, 1).contiguous().
        out_specs=pl.BlockSpec((tn, tv), lambda j, i: (i, j)),
        compiler_params=pltpu.CompilerParams(
            dimension_semantics=("parallel", "parallel"),
            vmem_limit_bytes=vmem_limit,
        ),
        cost_estimate=pl.CostEstimate(
            flops=2 * N * H * V,
            transcendentals=0,
            bytes_accessed=(N * H + H * V) * in_bytes + N * V * out_bytes,
        ),
    )(h_nh, w)

    return logits.reshape(B, S, V), labels


def lm_pipe_layer_ref(hidden_states, labels, weight, compute_dtype=None):
    h = hidden_states if compute_dtype is None else hidden_states.astype(compute_dtype)
    w = weight if compute_dtype is None else weight.astype(compute_dtype)
    logits = jnp.einsum("sbh,hv->sbv", h, w, preferred_element_type=jnp.float32)
    logits = jnp.transpose(logits, (1, 0, 2)).astype(hidden_states.dtype)
    return logits, labels


if __name__ == "__main__":
    # Small shapes consistent with the module: seq=8, batch=2, hidden=32, vocab=256.
    S, B, H, V = 8, 2, 32, 256

    key = jax.random.PRNGKey(0)
    k_h, k_w, k_l = jax.random.split(key, 3)

    hidden_states = jax.random.normal(k_h, (S, B, H), dtype=jnp.float32)
    # Deterministic init of output_layer: Linear(H -> V, bias=False), stored as [H, V].
    weight = (jax.random.normal(k_w, (H, V), dtype=jnp.float32) / jnp.sqrt(H)).astype(
        jnp.float32
    )
    labels = jax.random.randint(k_l, (B, S), 0, V, dtype=jnp.int32)

    logits, labels_out = jax.jit(lm_pipe_layer)(hidden_states, labels, weight)
    jax.block_until_ready(logits)

    # Reference uses the same bf16-cast inputs with f32 accumulation, so only
    # accumulation-order differences remain (tight tolerance is fine).
    ref_logits, ref_labels = lm_pipe_layer_ref(
        hidden_states, labels, weight, compute_dtype=jnp.bfloat16
    )
    # Loose sanity check against the pure-f32 math as well.
    f32_logits, _ = lm_pipe_layer_ref(hidden_states, labels, weight)

    assert logits.shape == (B, S, V), logits.shape
    assert logits.dtype == hidden_states.dtype
    assert jnp.allclose(logits, ref_logits, atol=2e-2, rtol=2e-2)
    assert jnp.allclose(logits, f32_logits, atol=1e-1, rtol=1e-1)
    assert jnp.array_equal(labels_out, ref_labels)

    print("KERNEL_OK")
</pallas_src>

<mosaic_0001>
module attributes {stable_mosaic.version = 11 : i64} {
  func.func @_lm_head_kernel(%arg0: i32, %arg1: i32, %arg2: memref<16x32xbf16, #tpu.memory_space<vmem>>, %arg3: memref<32x256xbf16, #tpu.memory_space<vmem>>, %arg4: memref<16x256xf32, #tpu.memory_space<vmem>>) attributes {dimension_semantics = [#tpu.dimension_semantics<parallel>, #tpu.dimension_semantics<parallel>], iteration_bounds = array<i64: 1, 1>, scalar_prefetch = 0 : i64, scratch_operands = 0 : i64, tpu.core_type = #tpu.core_type<tc>, window_params = [{transform_indices = @transform_0, window_bounds = array<i64: 16, 32>}, {transform_indices = @transform_1, window_bounds = array<i64: 32, 256>}, {transform_indices = @transform_2, window_bounds = array<i64: 16, 256>}]} {
    %c0 = arith.constant 0 : index
    %c0_0 = arith.constant 0 : index
    %0 = vector.load %arg2[%c0, %c0_0] : memref<16x32xbf16, #tpu.memory_space<vmem>>, vector<16x32xbf16>
    %c0_1 = arith.constant 0 : index
    %c0_2 = arith.constant 0 : index
    %1 = vector.load %arg3[%c0_1, %c0_2] : memref<32x256xbf16, #tpu.memory_space<vmem>>, vector<32x256xbf16>
    %cst = arith.constant dense<0.000000e+00> : vector<16x256xf32>
    %2 = tpu.matmul %0, %1, %cst {dimension_numbers = #tpu.dot_dimension_numbers<[1], [0], [0], [1], [0, 0, 1, 1], [], []>} : vector<16x32xbf16>, vector<32x256xbf16>, vector<16x256xf32> -> vector<16x256xf32>
    %c0_3 = arith.constant 0 : index
    %c0_4 = arith.constant 0 : index
    %3 = vector.load %arg4[%c0_3, %c0_4] : memref<16x256xf32, #tpu.memory_space<vmem>>, vector<16x256xf32>
    tpu.vector_store %arg4[%c0_3, %c0_4], %2 {strides = array<i32>} : memref<16x256xf32, #tpu.memory_space<vmem>>, vector<16x256xf32>,
    return
  }
  func.func @transform_0(%arg0: i32, %arg1: i32) -> (i32, i32) {
    %c0_i32 = arith.constant 0 : i32
    %c0_i32_0 = arith.constant 0 : i32
    return %arg1, %c0_i32 : i32, i32
  }
  func.func @transform_1(%arg0: i32, %arg1: i32) -> (i32, i32) {
    %c0_i32 = arith.constant 0 : i32
    %c0_i32_0 = arith.constant 0 : i32
    return %c0_i32, %arg0 : i32, i32
  }
  func.func @transform_2(%arg0: i32, %arg1: i32) -> (i32, i32) {
    %c0_i32 = arith.constant 0 : i32
    return %arg1, %arg0 : i32, i32
  }
}

</mosaic_0001>

<bundles_post_ra>
// kernel: lm_pipe_layer.1
= control target key start
LH: loop header
LB: loop body
LE: loop exit
PB: predicated region body
PF: predicated region fallthrough
CT: control target
= control target key end

     0   :  { %v152_v2 = vmov 0   ;;  %s198_s0 = inlined_call_operand.vmem [shape: bf16[16,32], index: 0, kind: input, shape index: {}]   ;;  %s199_s1 = inlined_call_operand.vmem [shape: bf16[32,256], index: 1, kind: input, shape index: {}]   ;;  %s200_s2 = inlined_call_operand.hbm [shape: f32[16,256], index: 2, kind: output, shape index: {}]  }
   0x1   :  { %v121_v0 = vld [vmem:[%s199_s1 + $0x4] ss:$8 sps:$4 sm:$0xff]   ;;  %v123_v1 = vld [vmem:[%s199_s1] ss:$8 sps:$4 sm:$0xff]   ;;  %80 = vmatprep.mubr.bf16.mxu0 %v152_v2  ;;  %v124_v3 = vld [vmem:[%s199_s1 + $0x14] ss:$8 sps:$4 sm:$0xff]  }
   0x2   :  { %48 = vmatprep.subr.bf16.mxu0 %v121_v0  ;;  %v126_v4 = vld [vmem:[%s199_s1 + $0x10] ss:$8 sps:$4 sm:$0xff]  }
   0x3   :  { %49 = vmatpush1.bf16.msra.mxu0 %v123_v1 }
   0x4   :  { %7 = vsyncpa [#allocation3], 0  ;;  %50 = vmatprep.subr.bf16.mxu0 %v124_v3  ;;  %v127_v5 = vld [vmem:[%s198_s0] sm:$0xff]   ;;  %vm44_vm0 = vcmask 261120   ;;  %s153_s19 = smov [#allocation2]  }
   0x5   :  { %s100_s20 = sshll.u32 %s153_s19, 4  ;;  %s101_s20 = int_to_ptr.vmem [resolvable:$true] %s100_s20 }
   0x6   :  { %s128_s1 = scalar_lea.vmem %s101_s20, 512  ;;  %p133_p1 = scmp.lt.s32.totalorder %s101_s20, %s101_s20 }
   0x7   :  { %51 = vmatpush1.bf16.msra.mxu0 %v126_v4  ;;  %p129_p0 = scmp.ne.s32.totalorder %s101_s20, %s128_s1  ;;  %p134_p2 = scmp.lt.s32.totalorder %s128_s1, %s128_s1 }
   0x9   :  { %p135_p3 = por %p134_p2, %p133_p1 }
   0xa   :  { %116 = vmatmul.mubr.msk.bf16.vlgmr.msra.gmra.mrb[0].mxu0 %vm44_vm0, %v127_v5 }
   0xb   :  { %p136_p4 = pnand %p135_p3, %p129_p0 }
  0xdd   :  { %v82_v6 = vpop.f32.mrb[0].mxu0 }
  0xde   :  { %91 = vst [vmem:[#allocation2] sm:$0xff] %v82_v6  ;;  %v84_v7 = vpop.f32.mrb[1].mxu0 }
  0xdf   :  { %92 = vst [vmem:[#allocation2 + $0x8] sm:$0xff] %v84_v7  ;;  %v86_v8 = vpop.f32.mrb[2].mxu0 }
  0xe0   :  { %93 = vst [vmem:[#allocation2 + $0x10] sm:$0xff] %v86_v8  ;;  %v88_v9 = vpop.f32.mrb[3].mxu0 }
  0xe1   :  { %94 = vst [vmem:[#allocation2 + $0x18] sm:$0xff] %v88_v9 }
  0xe2   :  { %139 = shalt.err (!%p136_p4)
}
  0xe3   :  { %s140_s22 = scalar_lea.hbm %s200_s2, 512 }
  0xe4   :  { %p141_p5 = scmp.ne.s32.totalorder %s200_s2, %s140_s22  ;;  %p144_p6 = scmp.lt.u32.totalorder %s140_s22, %s200_s2 }
  0xe6   :  { %p146_p7 = pnand %p144_p6, %p141_p5 }
  0xe8   :  { %149 = shalt.err (!%p146_p7)
}
  0xe9   :  { %s154_s27 = smov 256   ;;  %s155_s28 = smov 16  }
  0xea   :  { %106 = dma.vmem_to_hbm [thread:$0]  %s101_s20, 512, %s200_s2, [#allocation3], %s154_s27, %s154_s27, %s155_s28  }
  0xeb   :  { %150 = dma.done.wait [#allocation3], 512  }
  0xec   :  { %151 = vsyncadd [#allocation3], 4294966784 }
  0xed   :  { %110 = vsyncpa [#allocation3], 1 }

</bundles_post_ra>
